<compile_context>
chip_gen: v7x
topology: tpu7x:2x2x1
jax: 0.10.0
libtpu: 0.0.40
codegen_flags: <defaults>
</compile_context>

<pallas_src>
import functools

import jax
import jax.numpy as jnp
from jax import lax
from jax.experimental import pallas as pl
from jax.experimental.pallas import tpu as pltpu


def _patch_unembed_kernel(x_ref, w_ref, b_ref, o_ref, *, tH, W, r, out_chans):
    """One (batch, H-tile) grid step.

    x_ref: (1, Cin, tH*W)            NCHW pixels for tH image rows (lane axis = h*W + w)
    w_ref: (Cout, Cin)               1x1-conv weight, rows pre-permuted to (j, c, i) order
    b_ref: (Cout, 1)                 bias, same row order
    o_ref: (1, out_chans, tH*r, W*r) pixel-shuffled output tile (lane-dense trailing dim)
    """
    G = out_chans * r                                   # rows per sub-pixel group j

    # ---- 1x1 conv: one MXU matmul, wide lane-dense N = tH*W, f32 accumulation --------
    y = jnp.dot(w_ref[...], x_ref[0], preferred_element_type=jnp.float32)
    y = y + b_ref[...]                                  # (Cout, tH*W), rows (j, c, i)

    # ---- PixelShuffle on the MXU ------------------------------------------------------
    # scat[j] is a 0/1 scatter matrix mapping lane w -> lane w*r + j; dot(y_j, scat[j])
    # interleaves the sub-pixel index j into the lane axis, so the stores below are dense.
    w_idx = lax.broadcasted_iota(jnp.int32, (W, W * r), 0)
    l_idx = lax.broadcasted_iota(jnp.int32, (W, W * r), 1)
    scat = [(l_idx == w_idx * r + j).astype(jnp.float32) for j in range(r)]

    chunks = [[] for _ in range(out_chans)]             # per output channel
    for hh in range(tH):                                # static unroll (tH small / bounded)
        y_hh = y[:, hh * W:(hh + 1) * W]                # (Cout, W)   static lane slice
        o_hh = jnp.dot(y_hh[0:G, :], scat[0], preferred_element_type=jnp.float32)
        for j in range(1, r):
            o_hh = o_hh + jnp.dot(y_hh[j * G:(j + 1) * G, :], scat[j],
                                  preferred_element_type=jnp.float32)
        # o_hh[c*r + i, w*r + j] == conv(x)[c*r*r + i*r + j] at pixel (h, w)  (+ bias)
        for c in range(out_chans):
            chunks[c].append(o_hh[c * r:(c + 1) * r, :])       # (r, W*r): rows i

    # One big dense store per output channel: rows (hh*r + i), lanes (w*r + j).
    for c in range(out_chans):
        o_ref[0, c, :, :] = jnp.concatenate(chunks[c], axis=0).astype(o_ref.dtype)


def patch_unembed(x, w, b, *, patch_size, out_chans, tile_h=None):
    """Fused 1x1-conv + PixelShuffle (PatchUnEmbed.forward, kernel_size=1 path).

    x: (B, Cin, H, W)  NCHW, as in PyTorch
    w: (Cout, Cin)     PyTorch conv weight[:, :, 0, 0], Cout = out_chans * patch_size**2
    b: (Cout,)         PyTorch conv bias
    returns (B, out_chans, H*patch_size, W*patch_size)
    """
    B, Cin, H, W = x.shape
    r = patch_size
    Cout = out_chans * r * r
    assert w.shape == (Cout, Cin) and b.shape == (Cout,)

    if tile_h is None:
        tile_h = H                                   # whole image per step (small inputs)
    assert H % tile_h == 0
    # Block-shape legality: last two block dims must be (8,128)-divisible or full-extent.
    assert tile_h == H or ((tile_h * W) % 128 == 0 and (tile_h * r) % 8 == 0), (
        "tile_h*W must be a multiple of 128 (and tile_h*r of 8) unless tile_h == H")

    # Free reshape (NCHW is contiguous): no transpose, no extra HBM pass.
    x2 = x.reshape(B, Cin, H * W)

    # Re-order conv-weight rows from PyTorch's (c, i, j) to (j, c, i) so the kernel can
    # take contiguous row groups per sub-pixel j.  Tiny one-time op, fused by XLA.
    w_perm = jnp.transpose(w.reshape(out_chans, r, r, Cin), (2, 0, 1, 3)).reshape(Cout, Cin)
    b_perm = jnp.transpose(b.reshape(out_chans, r, r), (2, 0, 1)).reshape(Cout, 1)

    kernel = functools.partial(_patch_unembed_kernel,
                               tH=tile_h, W=W, r=r, out_chans=out_chans)

    itemsize = jnp.dtype(x.dtype).itemsize
    flops = int(2 * B * H * W * Cout * (Cin + W * r))        # conv + MXU pixel-shuffle
    bytes_accessed = int((x2.size + w_perm.size + b_perm.size
                          + B * out_chans * H * r * W * r) * itemsize)

    return pl.pallas_call(
        kernel,
        out_shape=jax.ShapeDtypeStruct((B, out_chans, H * r, W * r), x.dtype),
        grid=(B, H // tile_h),
        in_specs=[
            pl.BlockSpec((1, Cin, tile_h * W), lambda bi, hi: (bi, 0, hi)),
            pl.BlockSpec((Cout, Cin), lambda bi, hi: (0, 0)),
            pl.BlockSpec((Cout, 1), lambda bi, hi: (0, 0)),
        ],
        out_specs=pl.BlockSpec((1, out_chans, tile_h * r, W * r),
                               lambda bi, hi: (bi, 0, hi, 0)),
        compiler_params=pltpu.CompilerParams(
            dimension_semantics=("parallel", "parallel")),
        cost_estimate=pl.CostEstimate(flops=flops, transcendentals=0,
                                      bytes_accessed=bytes_accessed),
    )(x2, w_perm, b_perm)


def ref_forward(x, w, b, patch_size, out_chans):
    """Pure-JAX reference mirroring PyTorch NCHW semantics (1x1 conv + PixelShuffle)."""
    B, Cin, H, W = x.shape
    r = patch_size
    Cout = out_chans * r * r
    y = jnp.einsum('bchw,oc->bohw', x, w,
                   precision=lax.Precision.HIGHEST) + b.reshape(1, Cout, 1, 1)
    y = y.reshape(B, out_chans, r, r, H, W)
    y = jnp.transpose(y, (0, 1, 4, 2, 5, 3))
    return y.reshape(B, out_chans, H * r, W * r)


if __name__ == "__main__":
    key = jax.random.PRNGKey(0)
    k_x, k_w, k_b = jax.random.split(key, 3)

    # Module defaults: patch_size=4, out_chans=3, embed_dim=96, kernel_size=1.
    B, H, W = 2, 16, 16
    patch_size, out_chans, embed_dim = 4, 3, 96
    Cout = out_chans * patch_size ** 2

    x = jax.random.normal(k_x, (B, embed_dim, H, W), jnp.float32)
    w = jax.random.normal(k_w, (Cout, embed_dim), jnp.float32) * 0.1   # PyTorch (Cout, Cin)
    b = jax.random.normal(k_b, (Cout,), jnp.float32) * 0.1

    out = jax.block_until_ready(
        patch_unembed(x, w, b, patch_size=patch_size, out_chans=out_chans, tile_h=8))

    assert out.shape == (B, out_chans, H * patch_size, W * patch_size), out.shape
    ref = ref_forward(x, w, b, patch_size, out_chans)
    err = float(jnp.max(jnp.abs(out - ref)))
    assert err < 1e-3, f"mismatch vs reference: max abs err {err}"
    print("KERNEL_OK")
</pallas_src>

<mosaic_0001>
module attributes {stable_mosaic.version = 11 : i64} {
  func.func @_patch_unembed_kernel(%arg0: i32, %arg1: i32, %arg2: memref<1x96x128xf32, #tpu.memory_space<vmem>>, %arg3: memref<48x96xf32, #tpu.memory_space<vmem>>, %arg4: memref<48x1xf32, #tpu.memory_space<vmem>>, %arg5: memref<1x3x32x64xf32, #tpu.memory_space<vmem>>) attributes {dimension_semantics = [#tpu.dimension_semantics<parallel>, #tpu.dimension_semantics<parallel>], iteration_bounds = array<i64: 2, 2>, scalar_prefetch = 0 : i64, scratch_operands = 0 : i64, tpu.core_type = #tpu.core_type<tc>, window_params = [{transform_indices = @transform_0, window_bounds = array<i64: 1, 96, 128>}, {pipeline_mode = #tpu.pipeline_mode<synchronous>, transform_indices = @transform_1, window_bounds = array<i64: 48, 96>}, {pipeline_mode = #tpu.pipeline_mode<synchronous>, transform_indices = @transform_2, window_bounds = array<i64: 48, 1>}, {transform_indices = @transform_3, window_bounds = array<i64: 1, 3, 32, 64>}]} {
    %c0 = arith.constant 0 : index
    %c0_0 = arith.constant 0 : index
    %0 = vector.load %arg3[%c0, %c0_0] : memref<48x96xf32, #tpu.memory_space<vmem>>, vector<48x96xf32>
    %c0_1 = arith.constant 0 : index
    %c0_2 = arith.constant 0 : index
    %c0_3 = arith.constant 0 : index
    %1 = vector.load %arg2[%c0_1, %c0_2, %c0_3] : memref<1x96x128xf32, #tpu.memory_space<vmem>>, vector<1x96x128xf32>
    %2 = vector.shape_cast %1 : vector<1x96x128xf32> to vector<96x128xf32>
    %cst = arith.constant dense<0.000000e+00> : vector<48x128xf32>
    %3 = tpu.matmul %0, %2, %cst {dimension_numbers = #tpu.dot_dimension_numbers<[1], [0], [0], [1], [0, 0, 1, 1], [], []>} : vector<48x96xf32>, vector<96x128xf32>, vector<48x128xf32> -> vector<48x128xf32>
    %c0_4 = arith.constant 0 : index
    %c0_5 = arith.constant 0 : index
    %4 = vector.load %arg4[%c0_4, %c0_5] : memref<48x1xf32, #tpu.memory_space<vmem>>, vector<48x1xf32>
    %5 = vector.broadcast %4 : vector<48x1xf32> to vector<48x128xf32>
    %6 = arith.addf %3, %5 : vector<48x128xf32>
    %7 = tpu.iota {dimensions = array<i32: 0>} : vector<16x64xi32>
    %8 = tpu.iota {dimensions = array<i32: 1>} : vector<16x64xi32>
    %c4_i32 = arith.constant 4 : i32
    %9 = vector.broadcast %c4_i32 : i32 to vector<16x64xi32>
    %10 = arith.muli %7, %9 : vector<16x64xi32>
    %c0_i32 = arith.constant 0 : i32
    %11 = vector.broadcast %c0_i32 : i32 to vector<16x64xi32>
    %12 = arith.addi %10, %11 : vector<16x64xi32>
    %13 = arith.cmpi eq, %8, %12 : vector<16x64xi32>
    %14 = arith.extui %13 : vector<16x64xi1> to vector<16x64xi32>
    %15 = arith.sitofp %14 : vector<16x64xi32> to vector<16x64xf32>
    %c4_i32_6 = arith.constant 4 : i32
    %16 = vector.broadcast %c4_i32_6 : i32 to vector<16x64xi32>
    %17 = arith.muli %7, %16 : vector<16x64xi32>
    %c1_i32 = arith.constant 1 : i32
    %18 = vector.broadcast %c1_i32 : i32 to vector<16x64xi32>
    %19 = arith.addi %17, %18 : vector<16x64xi32>
    %20 = arith.cmpi eq, %8, %19 : vector<16x64xi32>
    %21 = arith.extui %20 : vector<16x64xi1> to vector<16x64xi32>
    %22 = arith.sitofp %21 : vector<16x64xi32> to vector<16x64xf32>
    %c4_i32_7 = arith.constant 4 : i32
    %23 = vector.broadcast %c4_i32_7 : i32 to vector<16x64xi32>
    %24 = arith.muli %7, %23 : vector<16x64xi32>
    %c2_i32 = arith.constant 2 : i32
    %25 = vector.broadcast %c2_i32 : i32 to vector<16x64xi32>
    %26 = arith.addi %24, %25 : vector<16x64xi32>
    %27 = arith.cmpi eq, %8, %26 : vector<16x64xi32>
    %28 = arith.extui %27 : vector<16x64xi1> to vector<16x64xi32>
    %29 = arith.sitofp %28 : vector<16x64xi32> to vector<16x64xf32>
    %c4_i32_8 = arith.constant 4 : i32
    %30 = vector.broadcast %c4_i32_8 : i32 to vector<16x64xi32>
    %31 = arith.muli %7, %30 : vector<16x64xi32>
    %c3_i32 = arith.constant 3 : i32
    %32 = vector.broadcast %c3_i32 : i32 to vector<16x64xi32>
    %33 = arith.addi %31, %32 : vector<16x64xi32>
    %34 = arith.cmpi eq, %8, %33 : vector<16x64xi32>
    %35 = arith.extui %34 : vector<16x64xi1> to vector<16x64xi32>
    %36 = arith.sitofp %35 : vector<16x64xi32> to vector<16x64xf32>
    %37 = vector.extract_strided_slice %6 {offsets = [0, 0], sizes = [48, 16], strides = [1, 1]} : vector<48x128xf32> to vector<48x16xf32>
    %38 = vector.extract_strided_slice %37 {offsets = [0, 0], sizes = [12, 16], strides = [1, 1]} : vector<48x16xf32> to vector<12x16xf32>
    %cst_9 = arith.constant dense<0.000000e+00> : vector<12x64xf32>
    %39 = tpu.matmul %38, %15, %cst_9 {dimension_numbers = #tpu.dot_dimension_numbers<[1], [0], [0], [1], [0, 0, 1, 1], [], []>} : vector<12x16xf32>, vector<16x64xf32>, vector<12x64xf32> -> vector<12x64xf32>
    %40 = vector.extract_strided_slice %37 {offsets = [12, 0], sizes = [12, 16], strides = [1, 1]} : vector<48x16xf32> to vector<12x16xf32>
    %cst_10 = arith.constant dense<0.000000e+00> : vector<12x64xf32>
    %41 = tpu.matmul %40, %22, %cst_10 {dimension_numbers = #tpu.dot_dimension_numbers<[1], [0], [0], [1], [0, 0, 1, 1], [], []>} : vector<12x16xf32>, vector<16x64xf32>, vector<12x64xf32> -> vector<12x64xf32>
    %42 = arith.addf %39, %41 : vector<12x64xf32>
    %43 = vector.extract_strided_slice %37 {offsets = [24, 0], sizes = [12, 16], strides = [1, 1]} : vector<48x16xf32> to vector<12x16xf32>
    %cst_11 = arith.constant dense<0.000000e+00> : vector<12x64xf32>
    %44 = tpu.matmul %43, %29, %cst_11 {dimension_numbers = #tpu.dot_dimension_numbers<[1], [0], [0], [1], [0, 0, 1, 1], [], []>} : vector<12x16xf32>, vector<16x64xf32>, vector<12x64xf32> -> vector<12x64xf32>
    %45 = arith.addf %42, %44 : vector<12x64xf32>
    %46 = vector.extract_strided_slice %37 {offsets = [36, 0], sizes = [12, 16], strides = [1, 1]} : vector<48x16xf32> to vector<12x16xf32>
    %cst_12 = arith.constant dense<0.000000e+00> : vector<12x64xf32>
    %47 = tpu.matmul %46, %36, %cst_12 {dimension_numbers = #tpu.dot_dimension_numbers<[1], [0], [0], [1], [0, 0, 1, 1], [], []>} : vector<12x16xf32>, vector<16x64xf32>, vector<12x64xf32> -> vector<12x64xf32>
    %48 = arith.addf %45, %47 : vector<12x64xf32>
    %49 = vector.extract_strided_slice %48 {offsets = [0, 0], sizes = [4, 64], strides = [1, 1]} : vector<12x64xf32> to vector<4x64xf32>
    %50 = vector.extract_strided_slice %48 {offsets = [4, 0], sizes = [4, 64], strides = [1, 1]} : vector<12x64xf32> to vector<4x64xf32>
    %51 = vector.extract_strided_slice %48 {offsets = [8, 0], sizes = [4, 64], strides = [1, 1]} : vector<12x64xf32> to vector<4x64xf32>
    %52 = vector.extract_strided_slice %6 {offsets = [0, 16], sizes = [48, 16], strides = [1, 1]} : vector<48x128xf32> to vector<48x16xf32>
    %53 = vector.extract_strided_slice %52 {offsets = [0, 0], sizes = [12, 16], strides = [1, 1]} : vector<48x16xf32> to vector<12x16xf32>
    %cst_13 = arith.constant dense<0.000000e+00> : vector<12x64xf32>
    %54 = tpu.matmul %53, %15, %cst_13 {dimension_numbers = #tpu.dot_dimension_numbers<[1], [0], [0], [1], [0, 0, 1, 1], [], []>} : vector<12x16xf32>, vector<16x64xf32>, vector<12x64xf32> -> vector<12x64xf32>
    %55 = vector.extract_strided_slice %52 {offsets = [12, 0], sizes = [12, 16], strides = [1, 1]} : vector<48x16xf32> to vector<12x16xf32>
    %cst_14 = arith.constant dense<0.000000e+00> : vector<12x64xf32>
    %56 = tpu.matmul %55, %22, %cst_14 {dimension_numbers = #tpu.dot_dimension_numbers<[1], [0], [0], [1], [0, 0, 1, 1], [], []>} : vector<12x16xf32>, vector<16x64xf32>, vector<12x64xf32> -> vector<12x64xf32>
    %57 = arith.addf %54, %56 : vector<12x64xf32>
    %58 = vector.extract_strided_slice %52 {offsets = [24, 0], sizes = [12, 16], strides = [1, 1]} : vector<48x16xf32> to vector<12x16xf32>
    %cst_15 = arith.constant dense<0.000000e+00> : vector<12x64xf32>
    %59 = tpu.matmul %58, %29, %cst_15 {dimension_numbers = #tpu.dot_dimension_numbers<[1], [0], [0], [1], [0, 0, 1, 1], [], []>} : vector<12x16xf32>, vector<16x64xf32>, vector<12x64xf32> -> vector<12x64xf32>
    %60 = arith.addf %57, %59 : vector<12x64xf32>
    %61 = vector.extract_strided_slice %52 {offsets = [36, 0], sizes = [12, 16], strides = [1, 1]} : vector<48x16xf32> to vector<12x16xf32>
    %cst_16 = arith.constant dense<0.000000e+00> : vector<12x64xf32>
    %62 = tpu.matmul %61, %36, %cst_16 {dimension_numbers = #tpu.dot_dimension_numbers<[1], [0], [0], [1], [0, 0, 1, 1], [], []>} : vector<12x16xf32>, vector<16x64xf32>, vector<12x64xf32> -> vector<12x64xf32>
    %63 = arith.addf %60, %62 : vector<12x64xf32>
    %64 = vector.extract_strided_slice %63 {offsets = [0, 0], sizes = [4, 64], strides = [1, 1]} : vector<12x64xf32> to vector<4x64xf32>
    %65 = vector.extract_strided_slice %63 {offsets = [4, 0], sizes = [4, 64], strides = [1, 1]} : vector<12x64xf32> to vector<4x64xf32>
    %66 = vector.extract_strided_slice %63 {offsets = [8, 0], sizes = [4, 64], strides = [1, 1]} : vector<12x64xf32> to vector<4x64xf32>
    %67 = vector.extract_strided_slice %6 {offsets = [0, 32], sizes = [48, 16], strides = [1, 1]} : vector<48x128xf32> to vector<48x16xf32>
    %68 = vector.extract_strided_slice %67 {offsets = [0, 0], sizes = [12, 16], strides = [1, 1]} : vector<48x16xf32> to vector<12x16xf32>
    %cst_17 = arith.constant dense<0.000000e+00> : vector<12x64xf32>
    %69 = tpu.matmul %68, %15, %cst_17 {dimension_numbers = #tpu.dot_dimension_numbers<[1], [0], [0], [1], [0, 0, 1, 1], [], []>} : vector<12x16xf32>, vector<16x64xf32>, vector<12x64xf32> -> vector<12x64xf32>
    %70 = vector.extract_strided_slice %67 {offsets = [12, 0], sizes = [12, 16], strides = [1, 1]} : vector<48x16xf32> to vector<12x16xf32>
    %cst_18 = arith.constant dense<0.000000e+00> : vector<12x64xf32>
    %71 = tpu.matmul %70, %22, %cst_18 {dimension_numbers = #tpu.dot_dimension_numbers<[1], [0], [0], [1], [0, 0, 1, 1], [], []>} : vector<12x16xf32>, vector<16x64xf32>, vector<12x64xf32> -> vector<12x64xf32>
    %72 = arith.addf %69, %71 : vector<12x64xf32>
    %73 = vector.extract_strided_slice %67 {offsets = [24, 0], sizes = [12, 16], strides = [1, 1]} : vector<48x16xf32> to vector<12x16xf32>
    %cst_19 = arith.constant dense<0.000000e+00> : vector<12x64xf32>
    %74 = tpu.matmul %73, %29, %cst_19 {dimension_numbers = #tpu.dot_dimension_numbers<[1], [0], [0], [1], [0, 0, 1, 1], [], []>} : vector<12x16xf32>, vector<16x64xf32>, vector<12x64xf32> -> vector<12x64xf32>
    %75 = arith.addf %72, %74 : vector<12x64xf32>
    %76 = vector.extract_strided_slice %67 {offsets = [36, 0], sizes = [12, 16], strides = [1, 1]} : vector<48x16xf32> to vector<12x16xf32>
    %cst_20 = arith.constant dense<0.000000e+00> : vector<12x64xf32>
    %77 = tpu.matmul %76, %36, %cst_20 {dimension_numbers = #tpu.dot_dimension_numbers<[1], [0], [0], [1], [0, 0, 1, 1], [], []>} : vector<12x16xf32>, vector<16x64xf32>, vector<12x64xf32> -> vector<12x64xf32>
    %78 = arith.addf %75, %77 : vector<12x64xf32>
    %79 = vector.extract_strided_slice %78 {offsets = [0, 0], sizes = [4, 64], strides = [1, 1]} : vector<12x64xf32> to vector<4x64xf32>
    %80 = vector.extract_strided_slice %78 {offsets = [4, 0], sizes = [4, 64], strides = [1, 1]} : vector<12x64xf32> to vector<4x64xf32>
    %81 = vector.extract_strided_slice %78 {offsets = [8, 0], sizes = [4, 64], strides = [1, 1]} : vector<12x64xf32> to vector<4x64xf32>
    %82 = vector.extract_strided_slice %6 {offsets = [0, 48], sizes = [48, 16], strides = [1, 1]} : vector<48x128xf32> to vector<48x16xf32>
    %83 = vector.extract_strided_slice %82 {offsets = [0, 0], sizes = [12, 16], strides = [1, 1]} : vector<48x16xf32> to vector<12x16xf32>
    %cst_21 = arith.constant dense<0.000000e+00> : vector<12x64xf32>
    %84 = tpu.matmul %83, %15, %cst_21 {dimension_numbers = #tpu.dot_dimension_numbers<[1], [0], [0], [1], [0, 0, 1, 1], [], []>} : vector<12x16xf32>, vector<16x64xf32>, vector<12x64xf32> -> vector<12x64xf32>
    %85 = vector.extract_strided_slice %82 {offsets = [12, 0], sizes = [12, 16], strides = [1, 1]} : vector<48x16xf32> to vector<12x16xf32>
    %cst_22 = arith.constant dense<0.000000e+00> : vector<12x64xf32>
    %86 = tpu.matmul %85, %22, %cst_22 {dimension_numbers = #tpu.dot_dimension_numbers<[1], [0], [0], [1], [0, 0, 1, 1], [], []>} : vector<12x16xf32>, vector<16x64xf32>, vector<12x64xf32> -> vector<12x64xf32>
    %87 = arith.addf %84, %86 : vector<12x64xf32>
    %88 = vector.extract_strided_slice %82 {offsets = [24, 0], sizes = [12, 16], strides = [1, 1]} : vector<48x16xf32> to vector<12x16xf32>
    %cst_23 = arith.constant dense<0.000000e+00> : vector<12x64xf32>
    %89 = tpu.matmul %88, %29, %cst_23 {dimension_numbers = #tpu.dot_dimension_numbers<[1], [0], [0], [1], [0, 0, 1, 1], [], []>} : vector<12x16xf32>, vector<16x64xf32>, vector<12x64xf32> -> vector<12x64xf32>
    %90 = arith.addf %87, %89 : vector<12x64xf32>
    %91 = vector.extract_strided_slice %82 {offsets = [36, 0], sizes = [12, 16], strides = [1, 1]} : vector<48x16xf32> to vector<12x16xf32>
    %cst_24 = arith.constant dense<0.000000e+00> : vector<12x64xf32>
    %92 = tpu.matmul %91, %36, %cst_24 {dimension_numbers = #tpu.dot_dimension_numbers<[1], [0], [0], [1], [0, 0, 1, 1], [], []>} : vector<12x16xf32>, vector<16x64xf32>, vector<12x64xf32> -> vector<12x64xf32>
    %93 = arith.addf %90, %92 : vector<12x64xf32>
    %94 = vector.extract_strided_slice %93 {offsets = [0, 0], sizes = [4, 64], strides = [1, 1]} : vector<12x64xf32> to vector<4x64xf32>
    %95 = vector.extract_strided_slice %93 {offsets = [4, 0], sizes = [4, 64], strides = [1, 1]} : vector<12x64xf32> to vector<4x64xf32>
    %96 = vector.extract_strided_slice %93 {offsets = [8, 0], sizes = [4, 64], strides = [1, 1]} : vector<12x64xf32> to vector<4x64xf32>
    %97 = vector.extract_strided_slice %6 {offsets = [0, 64], sizes = [48, 16], strides = [1, 1]} : vector<48x128xf32> to vector<48x16xf32>
    %98 = vector.extract_strided_slice %97 {offsets = [0, 0], sizes = [12, 16], strides = [1, 1]} : vector<48x16xf32> to vector<12x16xf32>
    %cst_25 = arith.constant dense<0.000000e+00> : vector<12x64xf32>
    %99 = tpu.matmul %98, %15, %cst_25 {dimension_numbers = #tpu.dot_dimension_numbers<[1], [0], [0], [1], [0, 0, 1, 1], [], []>} : vector<12x16xf32>, vector<16x64xf32>, vector<12x64xf32> -> vector<12x64xf32>
    %100 = vector.extract_strided_slice %97 {offsets = [12, 0], sizes = [12, 16], strides = [1, 1]} : vector<48x16xf32> to vector<12x16xf32>
    %cst_26 = arith.constant dense<0.000000e+00> : vector<12x64xf32>
    %101 = tpu.matmul %100, %22, %cst_26 {dimension_numbers = #tpu.dot_dimension_numbers<[1], [0], [0], [1], [0, 0, 1, 1], [], []>} : vector<12x16xf32>, vector<16x64xf32>, vector<12x64xf32> -> vector<12x64xf32>
    %102 = arith.addf %99, %101 : vector<12x64xf32>
    %103 = vector.extract_strided_slice %97 {offsets = [24, 0], sizes = [12, 16], strides = [1, 1]} : vector<48x16xf32> to vector<12x16xf32>
    %cst_27 = arith.constant dense<0.000000e+00> : vector<12x64xf32>
    %104 = tpu.matmul %103, %29, %cst_27 {dimension_numbers = #tpu.dot_dimension_numbers<[1], [0], [0], [1], [0, 0, 1, 1], [], []>} : vector<12x16xf32>, vector<16x64xf32>, vector<12x64xf32> -> vector<12x64xf32>
    %105 = arith.addf %102, %104 : vector<12x64xf32>
    %106 = vector.extract_strided_slice %97 {offsets = [36, 0], sizes = [12, 16], strides = [1, 1]} : vector<48x16xf32> to vector<12x16xf32>
    %cst_28 = arith.constant dense<0.000000e+00> : vector<12x64xf32>
    %107 = tpu.matmul %106, %36, %cst_28 {dimension_numbers = #tpu.dot_dimension_numbers<[1], [0], [0], [1], [0, 0, 1, 1], [], []>} : vector<12x16xf32>, vector<16x64xf32>, vector<12x64xf32> -> vector<12x64xf32>
    %108 = arith.addf %105, %107 : vector<12x64xf32>
    %109 = vector.extract_strided_slice %108 {offsets = [0, 0], sizes = [4, 64], strides = [1, 1]} : vector<12x64xf32> to vector<4x64xf32>
    %110 = vector.extract_strided_slice %108 {offsets = [4, 0], sizes = [4, 64], strides = [1, 1]} : vector<12x64xf32> to vector<4x64xf32>
    %111 = vector.extract_strided_slice %108 {offsets = [8, 0], sizes = [4, 64], strides = [1, 1]} : vector<12x64xf32> to vector<4x64xf32>
    %112 = vector.extract_strided_slice %6 {offsets = [0, 80], sizes = [48, 16], strides = [1, 1]} : vector<48x128xf32> to vector<48x16xf32>
    %113 = vector.extract_strided_slice %112 {offsets = [0, 0], sizes = [12, 16], strides = [1, 1]} : vector<48x16xf32> to vector<12x16xf32>
    %cst_29 = arith.constant dense<0.000000e+00> : vector<12x64xf32>
    %114 = tpu.matmul %113, %15, %cst_29 {dimension_numbers = #tpu.dot_dimension_numbers<[1], [0], [0], [1], [0, 0, 1, 1], [], []>} : vector<12x16xf32>, vector<16x64xf32>, vector<12x64xf32> -> vector<12x64xf32>
    %115 = vector.extract_strided_slice %112 {offsets = [12, 0], sizes = [12, 16], strides = [1, 1]} : vector<48x16xf32> to vector<12x16xf32>
    %cst_30 = arith.constant dense<0.000000e+00> : vector<12x64xf32>
    %116 = tpu.matmul %115, %22, %cst_30 {dimension_numbers = #tpu.dot_dimension_numbers<[1], [0], [0], [1], [0, 0, 1, 1], [], []>} : vector<12x16xf32>, vector<16x64xf32>, vector<12x64xf32> -> vector<12x64xf32>
    %117 = arith.addf %114, %116 : vector<12x64xf32>
    %118 = vector.extract_strided_slice %112 {offsets = [24, 0], sizes = [12, 16], strides = [1, 1]} : vector<48x16xf32> to vector<12x16xf32>
    %cst_31 = arith.constant dense<0.000000e+00> : vector<12x64xf32>
    %119 = tpu.matmul %118, %29, %cst_31 {dimension_numbers = #tpu.dot_dimension_numbers<[1], [0], [0], [1], [0, 0, 1, 1], [], []>} : vector<12x16xf32>, vector<16x64xf32>, vector<12x64xf32> -> vector<12x64xf32>
    %120 = arith.addf %117, %119 : vector<12x64xf32>
    %121 = vector.extract_strided_slice %112 {offsets = [36, 0], sizes = [12, 16], strides = [1, 1]} : vector<48x16xf32> to vector<12x16xf32>
    %cst_32 = arith.constant dense<0.000000e+00> : vector<12x64xf32>
    %122 = tpu.matmul %121, %36, %cst_32 {dimension_numbers = #tpu.dot_dimension_numbers<[1], [0], [0], [1], [0, 0, 1, 1], [], []>} : vector<12x16xf32>, vector<16x64xf32>, vector<12x64xf32> -> vector<12x64xf32>
    %123 = arith.addf %120, %122 : vector<12x64xf32>
    %124 = vector.extract_strided_slice %123 {offsets = [0, 0], sizes = [4, 64], strides = [1, 1]} : vector<12x64xf32> to vector<4x64xf32>
    %125 = vector.extract_strided_slice %123 {offsets = [4, 0], sizes = [4, 64], strides = [1, 1]} : vector<12x64xf32> to vector<4x64xf32>
    %126 = vector.extract_strided_slice %123 {offsets = [8, 0], sizes = [4, 64], strides = [1, 1]} : vector<12x64xf32> to vector<4x64xf32>
    %127 = vector.extract_strided_slice %6 {offsets = [0, 96], sizes = [48, 16], strides = [1, 1]} : vector<48x128xf32> to vector<48x16xf32>
    %128 = vector.extract_strided_slice %127 {offsets = [0, 0], sizes = [12, 16], strides = [1, 1]} : vector<48x16xf32> to vector<12x16xf32>
    %cst_33 = arith.constant dense<0.000000e+00> : vector<12x64xf32>
    %129 = tpu.matmul %128, %15, %cst_33 {dimension_numbers = #tpu.dot_dimension_numbers<[1], [0], [0], [1], [0, 0, 1, 1], [], []>} : vector<12x16xf32>, vector<16x64xf32>, vector<12x64xf32> -> vector<12x64xf32>
    %130 = vector.extract_strided_slice %127 {offsets = [12, 0], sizes = [12, 16], strides = [1, 1]} : vector<48x16xf32> to vector<12x16xf32>
    %cst_34 = arith.constant dense<0.000000e+00> : vector<12x64xf32>
    %131 = tpu.matmul %130, %22, %cst_34 {dimension_numbers = #tpu.dot_dimension_numbers<[1], [0], [0], [1], [0, 0, 1, 1], [], []>} : vector<12x16xf32>, vector<16x64xf32>, vector<12x64xf32> -> vector<12x64xf32>
    %132 = arith.addf %129, %131 : vector<12x64xf32>
    %133 = vector.extract_strided_slice %127 {offsets = [24, 0], sizes = [12, 16], strides = [1, 1]} : vector<48x16xf32> to vector<12x16xf32>
    %cst_35 = arith.constant dense<0.000000e+00> : vector<12x64xf32>
    %134 = tpu.matmul %133, %29, %cst_35 {dimension_numbers = #tpu.dot_dimension_numbers<[1], [0], [0], [1], [0, 0, 1, 1], [], []>} : vector<12x16xf32>, vector<16x64xf32>, vector<12x64xf32> -> vector<12x64xf32>
    %135 = arith.addf %132, %134 : vector<12x64xf32>
    %136 = vector.extract_strided_slice %127 {offsets = [36, 0], sizes = [12, 16], strides = [1, 1]} : vector<48x16xf32> to vector<12x16xf32>
    %cst_36 = arith.constant dense<0.000000e+00> : vector<12x64xf32>
    %137 = tpu.matmul %136, %36, %cst_36 {dimension_numbers = #tpu.dot_dimension_numbers<[1], [0], [0], [1], [0, 0, 1, 1], [], []>} : vector<12x16xf32>, vector<16x64xf32>, vector<12x64xf32> -> vector<12x64xf32>
    %138 = arith.addf %135, %137 : vector<12x64xf32>
    %139 = vector.extract_strided_slice %138 {offsets = [0, 0], sizes = [4, 64], strides = [1, 1]} : vector<12x64xf32> to vector<4x64xf32>
    %140 = vector.extract_strided_slice %138 {offsets = [4, 0], sizes = [4, 64], strides = [1, 1]} : vector<12x64xf32> to vector<4x64xf32>
    %141 = vector.extract_strided_slice %138 {offsets = [8, 0], sizes = [4, 64], strides = [1, 1]} : vector<12x64xf32> to vector<4x64xf32>
    %142 = vector.extract_strided_slice %6 {offsets = [0, 112], sizes = [48, 16], strides = [1, 1]} : vector<48x128xf32> to vector<48x16xf32>
    %143 = vector.extract_strided_slice %142 {offsets = [0, 0], sizes = [12, 16], strides = [1, 1]} : vector<48x16xf32> to vector<12x16xf32>
    %cst_37 = arith.constant dense<0.000000e+00> : vector<12x64xf32>
    %144 = tpu.matmul %143, %15, %cst_37 {dimension_numbers = #tpu.dot_dimension_numbers<[1], [0], [0], [1], [0, 0, 1, 1], [], []>} : vector<12x16xf32>, vector<16x64xf32>, vector<12x64xf32> -> vector<12x64xf32>
    %145 = vector.extract_strided_slice %142 {offsets = [12, 0], sizes = [12, 16], strides = [1, 1]} : vector<48x16xf32> to vector<12x16xf32>
    %cst_38 = arith.constant dense<0.000000e+00> : vector<12x64xf32>
    %146 = tpu.matmul %145, %22, %cst_38 {dimension_numbers = #tpu.dot_dimension_numbers<[1], [0], [0], [1], [0, 0, 1, 1], [], []>} : vector<12x16xf32>, vector<16x64xf32>, vector<12x64xf32> -> vector<12x64xf32>
    %147 = arith.addf %144, %146 : vector<12x64xf32>
    %148 = vector.extract_strided_slice %142 {offsets = [24, 0], sizes = [12, 16], strides = [1, 1]} : vector<48x16xf32> to vector<12x16xf32>
    %cst_39 = arith.constant dense<0.000000e+00> : vector<12x64xf32>
    %149 = tpu.matmul %148, %29, %cst_39 {dimension_numbers = #tpu.dot_dimension_numbers<[1], [0], [0], [1], [0, 0, 1, 1], [], []>} : vector<12x16xf32>, vector<16x64xf32>, vector<12x64xf32> -> vector<12x64xf32>
    %150 = arith.addf %147, %149 : vector<12x64xf32>
    %151 = vector.extract_strided_slice %142 {offsets = [36, 0], sizes = [12, 16], strides = [1, 1]} : vector<48x16xf32> to vector<12x16xf32>
    %cst_40 = arith.constant dense<0.000000e+00> : vector<12x64xf32>
    %152 = tpu.matmul %151, %36, %cst_40 {dimension_numbers = #tpu.dot_dimension_numbers<[1], [0], [0], [1], [0, 0, 1, 1], [], []>} : vector<12x16xf32>, vector<16x64xf32>, vector<12x64xf32> -> vector<12x64xf32>
    %153 = arith.addf %150, %152 : vector<12x64xf32>
    %154 = vector.extract_strided_slice %153 {offsets = [0, 0], sizes = [4, 64], strides = [1, 1]} : vector<12x64xf32> to vector<4x64xf32>
    %155 = vector.extract_strided_slice %153 {offsets = [4, 0], sizes = [4, 64], strides = [1, 1]} : vector<12x64xf32> to vector<4x64xf32>
    %156 = vector.extract_strided_slice %153 {offsets = [8, 0], sizes = [4, 64], strides = [1, 1]} : vector<12x64xf32> to vector<4x64xf32>
    %157 = tpu.concatenate %49, %64, %79, %94, %109, %124, %139, %154 in 0 : vector<4x64xf32>, vector<4x64xf32>, vector<4x64xf32>, vector<4x64xf32>, vector<4x64xf32>, vector<4x64xf32>, vector<4x64xf32>, vector<4x64xf32> -> vector<32x64xf32>
    %c0_41 = arith.constant 0 : index
    %c0_42 = arith.constant 0 : index
    %c0_43 = arith.constant 0 : index
    %c0_44 = arith.constant 0 : index
    %158 = vector.load %arg5[%c0_41, %c0_42, %c0_43, %c0_44] : memref<1x3x32x64xf32, #tpu.memory_space<vmem>>, vector<1x1x32x64xf32>
    %159 = vector.shape_cast %158 : vector<1x1x32x64xf32> to vector<32x64xf32>
    %160 = vector.shape_cast %157 : vector<32x64xf32> to vector<1x1x32x64xf32>
    tpu.vector_store %arg5[%c0_41, %c0_42, %c0_43, %c0_44], %160 {strides = array<i32>} : memref<1x3x32x64xf32, #tpu.memory_space<vmem>>, vector<1x1x32x64xf32>,
    %161 = tpu.concatenate %50, %65, %80, %95, %110, %125, %140, %155 in 0 : vector<4x64xf32>, vector<4x64xf32>, vector<4x64xf32>, vector<4x64xf32>, vector<4x64xf32>, vector<4x64xf32>, vector<4x64xf32>, vector<4x64xf32> -> vector<32x64xf32>
    %c0_45 = arith.constant 0 : index
    %c1 = arith.constant 1 : index
    %c0_46 = arith.constant 0 : index
    %c0_47 = arith.constant 0 : index
    %162 = vector.load %arg5[%c0_45, %c1, %c0_46, %c0_47] : memref<1x3x32x64xf32, #tpu.memory_space<vmem>>, vector<1x1x32x64xf32>
    %163 = vector.shape_cast %162 : vector<1x1x32x64xf32> to vector<32x64xf32>
    %164 = vector.shape_cast %161 : vector<32x64xf32> to vector<1x1x32x64xf32>
    tpu.vector_store %arg5[%c0_45, %c1, %c0_46, %c0_47], %164 {strides = array<i32>} : memref<1x3x32x64xf32, #tpu.memory_space<vmem>>, vector<1x1x32x64xf32>,
    %165 = tpu.concatenate %51, %66, %81, %96, %111, %126, %141, %156 in 0 : vector<4x64xf32>, vector<4x64xf32>, vector<4x64xf32>, vector<4x64xf32>, vector<4x64xf32>, vector<4x64xf32>, vector<4x64xf32>, vector<4x64xf32> -> vector<32x64xf32>
    %c0_48 = arith.constant 0 : index
    %c2 = arith.constant 2 : index
    %c0_49 = arith.constant 0 : index
    %c0_50 = arith.constant 0 : index
    %166 = vector.load %arg5[%c0_48, %c2, %c0_49, %c0_50] : memref<1x3x32x64xf32, #tpu.memory_space<vmem>>, vector<1x1x32x64xf32>
    %167 = vector.shape_cast %166 : vector<1x1x32x64xf32> to vector<32x64xf32>
    %168 = vector.shape_cast %165 : vector<32x64xf32> to vector<1x1x32x64xf32>
    tpu.vector_store %arg5[%c0_48, %c2, %c0_49, %c0_50], %168 {strides = array<i32>} : memref<1x3x32x64xf32, #tpu.memory_space<vmem>>, vector<1x1x32x64xf32>,
    return
  }
  func.func @transform_0(%arg0: i32, %arg1: i32) -> (i32, i32, i32) {
    %c0_i32 = arith.constant 0 : i32
    %c0_i32_0 = arith.constant 0 : i32
    return %arg0, %c0_i32, %arg1 : i32, i32, i32
  }
  func.func @transform_1(%arg0: i32, %arg1: i32) -> (i32, i32) {
    %c0_i32 = arith.constant 0 : i32
    %c0_i32_0 = arith.constant 0 : i32
    %c0_i32_1 = arith.constant 0 : i32
    return %c0_i32, %c0_i32_0 : i32, i32
  }
  func.func @transform_2(%arg0: i32, %arg1: i32) -> (i32, i32) {
    %c0_i32 = arith.constant 0 : i32
    %c0_i32_0 = arith.constant 0 : i32
    %c0_i32_1 = arith.constant 0 : i32
    return %c0_i32, %c0_i32_0 : i32, i32
  }
  func.func @transform_3(%arg0: i32, %arg1: i32) -> (i32, i32, i32, i32) {
    %c0_i32 = arith.constant 0 : i32
    %c0_i32_0 = arith.constant 0 : i32
    %c0_i32_1 = arith.constant 0 : i32
    return %arg0, %c0_i32, %arg1, %c0_i32_0 : i32, i32, i32, i32
  }
}

</mosaic_0001>

<bundles_post_ra>
// kernel: tpu_custom_call.1
= control target key start
LH: loop header
LB: loop body
LE: loop exit
PB: predicated region body
PF: predicated region fallthrough
CT: control target
= control target key end

     0   :  { %8 = vsyncpa [#allocation3], 0  ;;  %s4951_s0 = inlined_call_operand.hbm [shape: f32[2,96,256], index: 0, kind: input, shape index: {}]   ;;  %s4952_s1 = inlined_call_operand.vmem [shape: f32[48,96], index: 1, kind: input, shape index: {}]   ;;  %s4953_s2 = inlined_call_operand.vmem [shape: f32[48,1], index: 2, kind: input, shape index: {}]   ;;  %s4954_s3 = inlined_call_operand.hbm [shape: f32[2,3,64,64], index: 3, kind: output, shape index: {}]  }
   0x1   :  { %10 = vsyncpa [#allocation3 + $0x1], 0 }
   0x2   :  { %11 = vsyncpa [#allocation4], 0 }
   0x3   :  { %13 = vsyncpa [#allocation4 + $0x1], 0  ;;  %s4309_s12 = smov 0   ;;  %s4311_s13 = smov 0  }
   0x4   :  { %s4313_s14 = smov 0   ;;  %s4315_s15 = smov 0  }
   0x5   :  { %s4317_s16 = smov 0   ;;  %s4319_s17 = smov 0  }
   0x6   :  { %s4321_s18 = smov 0   ;;  %s4323_s19 = smov 0  }
   0x7 LB: > { %s3295_s20 = sadd.s32 4294967295, %s4267_s19   ;;  %s3296_s21 = sadd.s32 4294967294, %s4267_s19   ;;  %s4267_s19 = sphi %s4323_s19, %s19_s19   ;;  %s4263_s18 = sphi %s4321_s18, %s4977_s18   ;;  %s4259_s17 = sphi %s4319_s17, %s4976_s17   ;;  %s4255_s16 = sphi %s4317_s16, %s4975_s16   ;;  %s4251_s15 = sphi %s4315_s15, %s4974_s15   ;;  %s4247_s14 = sphi %s4313_s14, %s4973_s14   ;;  %s4243_s13 = sphi %s4311_s13, %s4972_s13   ;;  %s4239_s12 = sphi %s4309_s12, %s4971_s12  }
   0x8   : > { %s28_s22 = sadd.s32 1, %s4259_s17  ;;  %s31_s23 = sadd.s32 1, %s4263_s18 }
   0x9   : > { %p29_p0 = scmp.ge.s32.totalorder %s28_s22, 2  ;;  %s40_s24 = sadd.s32 1, %s4247_s14 }
   0xa   : > { %p47_p1 = scmp.ne.s32.totalorder %s4247_s14, %s4243_s13  ;;  %p48_p2 = scmp.eq.s32.totalorder %s4267_s19, 0 }
   0xb   : > { %s4979_s22 = smov (%p29_p0, %s28_s22), 0  ;;  %s4981_s23 = smov (!%p29_p0, %s31_s23), %s4263_s18 }
   0xc   : > { %s36_s25 = ssub.s32 %s4259_s17, %s4979_s22  ;;  %p4362_p3 = por %p48_p2, %p47_p1 }
   0xd   : > { %p33_p4 = scmp.ge.s32.totalorder %s4981_s23, 2  ;;  %p53_p5 = scmp.ne.s32.totalorder %s4243_s13, %s4239_s12 }
   0xe   : > { %p54_p6 = scmp.eq.s32.totalorder %s3295_s20, 0  ;;  %p121_p7 = scmp.eq.s32.totalorder %s3295_s20, 3 }
   0xf   : > { %s4983_s23 = smov (%p33_p4, %s4981_s23), 0  ;;  %p127_p10 = scmp.eq.s32.totalorder %s3296_s21, 3 }
  0x10   : > { %p4370_p8 = por %p54_p6, %p53_p5  ;;  %p4374_p9 = por %p121_p7, %p47_p1 }
  0x11   : > { %s35_s29 = ssub.s32 %s4263_s18, %s4983_s23  ;;  %p4380_p12 = por %p127_p10, %p53_p5 }
  0x12   : > { %s4958_s28 = scalar_select %p4374_p9, 1, 0 }
  0x13   : > { %s37_s30 = sor.u32 %s36_s25, %s35_s29  ;;  %p4080_p13 = scmp.lt.s32.totalorder %s4267_s19, 4 }
  0x14   : > { %p38_p11 = scmp.eq.s32.totalorder %s37_s30, 0  ;;  %s153_s5 = sand.u32 1, %s4247_s14  }
  0x15   : > { %s4959_s4 = scalar_select %p4380_p12, 1, 0 }
  0x16   : > { %s4387_s6 = scalar_select %p38_p11, %s4247_s14, %s40_s24  }
  0x17   : > { %s4058_s7 = smul.u32 96, %s153_s5  ;;  %p4392_p0 = pnand %p4080_p13, %p4362_p3 }
  0x18   : > { %s4059_s8 = smul.u32 24, %s4263_s18  ;;  %s4404_s26 = scalar_lea.sflag [#allocation3], %s153_s5 }
  0x19   : > { %s157_s11 = scalar_lea.vmem [#allocation2], %s4058_s7  ;;  %p4169_p2 = pneg %p4392_p0 }
  0x1a   : > { %s162_s10 = sadd.s32 %s4259_s17, %s4059_s8  ;;  %s165_s20 = sshll.u32 %s157_s11, 4  ;;  %s4397_s20 = int_to_ptr.vmem [resolvable:$true] %s165_s20 }
  0x1b   : > { %s3299_s21 = sshll.u32 %s162_s10, 7  ;;  %s4172_s10 = scalar_lea.hbm %s4951_s0, 6144 }
  0x1c   : > { %s4402_s24 = scalar_lea.hbm %s4951_s0, %s3299_s21 }
  0x1d   : > { %s4167_s30 = scalar_lea.hbm %s4402_s24, 1536  ;;  %p4173_p5 = scmp.lt.u32.totalorder %s4402_s24, %s4951_s0 }
  0x1e   : > { %p4168_p1 = scmp.ne.s32.totalorder %s4402_s24, %s4167_s30  ;;  %p4174_p6 = scmp.lt.u32.totalorder %s4172_s10, %s4167_s30 }
  0x1f   : > { %p4176_p10 = scmp.lt.u32.totalorder %s4167_s30, %s4402_s24 }
  0x20   : > { %p4170_p3 = pnand %p4169_p2, %p4168_p1  ;;  %p4175_p7 = por %p4174_p6, %p4173_p5 }
  0x22   : > { %p4171_p4 = pneg %p4170_p3  ;;  %p4177_p11 = por %p4176_p10, %p4175_p7 }
  0x24   : > { %p4178_p13 = pnand %p4177_p11, %p4171_p4 }
  0x26   : > { %4181 = shalt.err (!%p4178_p13)
}
  0x27   : > { %s4182_s5 = scalar_lea.vmem %s4397_s20, 1536  ;;  %s4269_s25 = smov [#allocation2]  }
  0x28   : > { %p4183_p1 = scmp.ne.s32.totalorder %s4397_s20, %s4182_s5  ;;  %s4187_s29 = sshll.u32 %s4269_s25, 4  ;;  %s4188_s29 = int_to_ptr.vmem [resolvable:$false] %s4187_s29 }
  0x29   : > { %s4189_s7 = scalar_lea.vmem %s4188_s29, 3072  ;;  %p4190_p9 = scmp.lt.s32.totalorder %s4397_s20, %s4188_s29 }
  0x2a   : > { %p4185_p3 = pnand %p4183_p1, %p4169_p2  ;;  %p4191_p5 = scmp.lt.s32.totalorder %s4189_s7, %s4182_s5 }
  0x2c   : > { %p4186_p12 = pneg %p4185_p3  ;;  %p4192_p6 = por %p4191_p5, %p4190_p9 }
  0x2e   : > { %p4193_p7 = pnand %p4192_p6, %p4186_p12 }
  0x30   : > { %4196 = shalt.err (!%p4193_p7)
}
  0x31   : > { %s4270_s30 = smov 256   ;;  %s4271_s8 = smov 128  }
  0x32   : > { %s4272_s10 = smov 8   ;;  %p3300_p2 = scmp.ge.s32.totalorder %s4267_s19, 1 }
  0x33   : > { %4075 = dma.hbm_to_vmem [thread:$0]  (!%p4392_p0), %s4402_s24, 1536, %s4397_s20, %s4404_s26, %s4270_s30, %s4271_s8, %s4272_s10  }
  0x34   : > { %p173_p4 = scmp.lt.s32.totalorder %s4267_s19, 5 }
  0x36   : > { %p174_p10 = pnand %p3300_p2, %p173_p4 }
  0x37   : > { %s4435_s11 = sand.u32 (!%p174_p10), 1, %s4243_s13  }
  0x38   : > { %177 = sbr.rel (%p174_p10) target bundleno = 765 (0x2fd), region = 32  ;;  %s180_s5 = scalar_lea.sflag (!%p174_p10), [#allocation3], %s4435_s11 }
  0x39   : > { %s4060_s21 = smul.u32 (!%p174_p10), 96, %s4435_s11 }
  0x3b   : > { %s4441_s25 = scalar_lea.vmem (!%p174_p10), [#allocation2], %s4060_s21 }
  0x3f   : > { %4230 = dma.done.wait (%p4370_p8), %s180_s5, 1536  }
  0x40   : > { %4232 = vsyncadd (%p4370_p8), %s180_s5, 4294965760  ;;  %v4273_v0 = vmov 0   ;;  %v213_v1 = vld [vmem:[%s4441_s25] sm:$0xff]  ;;  %v214_v2 = vld [vmem:[%s4441_s25 + $0x8] sm:$0xff]  ;;  %vm261_vm0 = vcmask 785408   ;;  %v375_v31 = vlaneseq  ;;  %vm414_vm13 = vcmask 1043456  }
  0x41   : > { %4165 = vset.pattern.permute.xlu0 %v4273_v0  ;;  %4166 = vset.pattern.permute.xlu1 %v4273_v0  ;;  %v215_v3 = vld [vmem:[%s4441_s25 + $0x10] sm:$0xff]  ;;  %v3858_v4 = vpack.c.bf16 %v214_v2, %v213_v1  ;;  %v216_v5 = vld [vmem:[%s4441_s25 + $0x18] sm:$0xff]  ;;  %v217_v7 = vld [vmem:[%s4441_s25 + $0x20] sm:$0xff]  ;;  %v4274_v40 = vmov 1.0|1.0   ;;  %vm418_vm14 = vcmask 130048  }
  0x42   : > { %v3862_v6 = vpack.c.bf16 %v216_v5, %v215_v3  ;;  %v218_v8 = vld [vmem:[%s4441_s25 + $0x28] sm:$0xff]  ;;  %v207_v9 = vld [vmem:[%s4952_s1] sm:$0xff]  ;;  %v219_v11 = vld [vmem:[%s4441_s25 + $0x30] sm:$0xff]  ;;  %v376_v32 = vshrl.u32 %v375_v31, 7  ;;  %v379_v36 = vand.u32 127, %v375_v31  ;;  %s4275_s9 = smov 112  }
  0x43   : > { %3859 = vmatprep.subr.bf16.mxu0 %v3858_v4  ;;  %v3866_v10 = vpack.c.bf16 %v218_v8, %v217_v7  ;;  %3625 = vmatprep.mubr.msk.f32.mxu0 %vm261_vm0, %v207_v9  ;;  %v220_v12 = vld [vmem:[%s4441_s25 + $0x38] sm:$0xff]  ;;  %v226_v13 = vld [vmem:[%s4953_s2 + $0x8] sm:$0xff]  ;;  %v225_v14 = vld [vmem:[%s4953_s2] sm:$0xff]  ;;  %s4276_s20 = smov 80   ;;  %s4277_s24 = smov 96   ;;  %vm3114_vm15 = vcmask 523264  }
  0x44   : > { %3861 = vmatpush3.bf16.msra.mxu0 %v3858_v4  ;;  %238 = vperm.xlu0 %4165, %v226_v13   ;;  %v227_v15 = vld [vmem:[%s4953_s2 + $0x10] sm:$0xff]  ;;  %v228_v16 = vld [vmem:[%s4953_s2 + $0x18] sm:$0xff]  ;;  %v3870_v17 = vpack.c.bf16 %v220_v12, %v219_v11  ;;  %v221_v18 = vld [vmem:[%s4441_s25 + $0x40] sm:$0xff]  ;;  %v377_v33 = vadd.s32 8, %v376_v32  ;;  %v380_v34 = vmul.u32 4, %v376_v32  ;;  %s4278_s26 = smov 48  }
  0x45   : > { %3863 = vmatprep.subr.bf16.mxu0 %v3862_v6  ;;  %233 = vperm.xlu1 %4166, %v225_v14   ;;  %v222_v19 = vld [vmem:[%s4441_s25 + $0x48] sm:$0xff]  ;;  %v229_v20 = vld [vmem:[%s4953_s2 + $0x20] sm:$0xff]  ;;  %v223_v23 = vld [vmem:[%s4441_s25 + $0x50] sm:$0xff]  ;;  %s4279_s29 = smov 64   ;;  %s4280_s7 = smov 16  }
  0x46   : > { %v230_v21 = vld [vmem:[%s4953_s2 + $0x28] sm:$0xff]  ;;  %v3874_v22 = vpack.c.bf16 %v222_v19, %v221_v18  ;;  %v224_v24 = vld [vmem:[%s4441_s25 + $0x58] sm:$0xff]  ;;  %v209_v27 = vld [vmem:[%s4952_s1 + $0x10] sm:$0xff]  ;;  %v381_v35 = vmul.u32 4, %v377_v33  ;;  %v388_v37 = vadd.s32 1, %v380_v34  ;;  %vm382_vm4 = vcmp.eq.s32.totalorder %v379_v36, %v380_v34  ;;  %s4281_s25 = smov 32  }
  0x47   : > { %v3878_v25 = vpack.c.bf16 %v224_v24, %v223_v23  ;;  %v208_v26 = vld [vmem:[%s4952_s1 + $0x8] sm:$0xff]  ;;  %v210_v28 = vld [vmem:[%s4952_s1 + $0x18] sm:$0xff]  ;;  %v211_v29 = vld [vmem:[%s4952_s1 + $0x20] sm:$0xff]  ;;  %v396_v42 = vadd.s32 2, %v380_v34  ;;  %v404_v45 = vadd.s32 3, %v380_v34  ;;  %s4866_s30 = scalar_lea.vmem [#allocation5], %s4060_s21 }
  0x48   : > { %3865 = vmatpush3.bf16.msra.mxu0 %v3862_v6  ;;  %243 = vperm.xlu0 %4165, %v227_v15   ;;  %v212_v30 = vld [vmem:[%s4952_s1 + $0x28] sm:$0xff]  ;;  %v389_v38 = vadd.s32 1, %v381_v35  ;;  %vm390_vm1 = vcmp.eq.s32.totalorder %v379_v36, %v388_v37  ;;  %vm383_vm5 = vcmp.eq.s32.totalorder %v379_v36, %v381_v35  ;;  %v397_v43 = vadd.s32 2, %v381_v35  ;;  %s3162_s21 = scalar_lea.sflag [#allocation4], %s4435_s11 }
  0x49   : > { %3867 = vmatprep.subr.bf16.mxu0 %v3866_v10  ;;  %248 = vperm.xlu1 %4166, %v228_v16   ;;  %vm4517_vm6 = vmpackc.low %vm383_vm5, %vm382_vm4  ;;  %vm398_vm7 = vcmp.eq.s32.totalorder %v379_v36, %v396_v42  ;;  %v405_v46 = vadd.s32 3, %v381_v35  ;;  %vm406_vm10 = vcmp.eq.s32.totalorder %v379_v36, %v404_v45 }
  0x4a   : > { %vm391_vm2 = vcmp.eq.s32.totalorder %v379_v36, %v389_v38  ;;  %vm399_vm8 = vcmp.eq.s32.totalorder %v379_v36, %v397_v43 }
  0x4b   : > { %vm4501_vm3 = vmpackc.low %vm391_vm2, %vm390_vm1  ;;  %vm407_vm11 = vcmp.eq.s32.totalorder %v379_v36, %v405_v46 }
  0x4c   : > { %3869 = vmatpush3.bf16.msra.mxu0 %v3866_v10  ;;  %253 = vperm.xlu0 %4165, %v229_v20   ;;  %vm4527_vm9 = vmpackc.low %vm399_vm8, %vm398_vm7 }
  0x4d   : > { %3871 = vmatprep.subr.bf16.mxu0 %v3870_v17  ;;  %258 = vperm.xlu1 %4166, %v230_v21   ;;  %vm4531_vm12 = vmpackc.low %vm407_vm11, %vm406_vm10 }
  0x4e   : > { %3883 = vmatprep.subr.msk.bf16.mxu1 %vm4501_vm3, %v4274_v40 }
  0x4f   : > { %3885 = vmatpush3.bf16.msk.msra.mxu1 %vm4501_vm3, %v4274_v40 }
  0x50   : > { %3873 = vmatpush3.bf16.msra.mxu0 %v3870_v17  ;;  %3887 = vmatprep.subr.msk.bf16.mxu1 %vm4517_vm6, %v4274_v40 }
  0x51   : > { %3875 = vmatprep.subr.bf16.mxu0 %v3874_v22 }
  0x54   : > { %3877 = vmatpush3.bf16.msra.mxu0 %v3874_v22 }
  0x55   : > { %3879 = vmatprep.subr.bf16.mxu0 %v3878_v25 }
  0x58   : > { %3881 = vmatpush3.bf16.msra.mxu0 %v3878_v25 }
  0x59   : > { %3915 = vmatprep.subr.msk.bf16.mxu0 %vm4501_vm3, %v4274_v40 }
  0x5b   : > { %3626 = vmatmul.mubr.msk.f32.vlgmr.msra.gmra.mrb[0].mxu0 %vm261_vm0, %v208_v26 }
  0x5c   : > { %3628 = vmatprep.mubr.msk.f32.mxu0 %vm261_vm0, %v209_v27  ;;  %3917 = vmatpush3.bf16.msk.msra.mxu0 %vm4501_vm3, %v4274_v40 }
  0x5d   : > { %3919 = vmatprep.subr.msk.bf16.mxu0 %vm4517_vm6, %v4274_v40 }
  0x5f   : > { %3629 = vmatmul.mubr.msk.f32.gmra.mrb[2].mxu0 %vm261_vm0, %v210_v28 }
  0x60   : > { %3631 = vmatprep.mubr.msk.f32.mxu0 %vm261_vm0, %v211_v29 }
  0x63   : > { %3632 = vmatmul.mubr.msk.f32.gmra.mrb[4].mxu0 %vm261_vm0, %v212_v30 }
  0xc3   : > { %v239_v48 = vpop.permute.xlu0 %238 }
  0xc4   : > { %v234_v51 = vpop.permute.xlu1 %233 }
  0xc7   : > { %v244_v54 = vpop.permute.xlu0 %243 }
  0xc8   : > { %v249_v63 = vpop.permute.xlu1 %248 }
  0xcb   : > { %v254_v2 = vpop.permute.xlu0 %253 }
  0xcc   : > { %v259_v1 = vpop.permute.xlu1 %258 }
 0x12e   : > { %v3627_v49 = vpop.f32.mrb[0].mxu0 }
 0x12f   : > { %v346_v50 = vpop.f32.mrb[1].mxu0  ;;  %v4535_v52 = vadd.f32 %v3627_v49, %v239_v48 }
 0x130   : > { %v4546_v62 = vadd.f32 %v346_v50, %v234_v51 }
 0x131   : > { %v415_v59 = vrot.slane %v4535_v52, 4 }
 0x132   : > { %v3630_v53 = vpop.f32.mrb[2].mxu0 }
 0x133   : > { %v356_v55 = vpop.f32.mrb[3].mxu0  ;;  %v4566_v0 = vadd.f32 %v3630_v53, %v249_v63 }
 0x134   : > { %v357_v56 = vadd.f32 %v356_v55, %v244_v54 }
 0x136   : > { %v4537_v57 = vrot.slane %v357_v56, 4  ;;  %v3633_v58 = vpop.f32.mrb[4].mxu0 }
 0x137   : > { %v366_v60 = vpop.f32.mrb[5].mxu0  ;;  %v372_v3 = vadd.f32 %v3633_v58, %v259_v1 }
 0x138   : > { %748 = vrot.lane.b32.xlu1 %v4537_v57, %s4275_s9  ;;  %v4544_v61 = vsel %vm414_vm13, %v415_v59, %v4537_v57  ;;  %v4572_v4 = vadd.f32 %v366_v60, %v254_v2 }
 0x139   : > { %746 = vrot.lane.b32.xlu0 %v4544_v61, %s4275_s9  ;;  %3638 = vmatprep.mubr.msk.f32.mxu1 %vm418_vm14, %v4544_v61  ;;  %v663_v5 = vrot.slane %v372_v3, 4 }
 0x13a   : > { %3639 = vmatmul.mubr.msk.f32.vlgmr.msra.gmra.mrb[0].mxu1 %vm418_vm14, %v4537_v57  ;;  %v662_v6 = vrot.slane %v4572_v4, 4 }
 0x13b   : > { %3645 = vmatprep.mubr.msk.f32.mxu1 %vm418_vm14, %v4546_v62  ;;  %3889 = vmatpush3.bf16.msk.msra.mxu1 %vm4517_vm6, %v4274_v40 }
 0x13c   : > { %831 = vrot.lane.b32.xlu1 %v4535_v52, %s4275_s9  ;;  %3891 = vmatprep.subr.msk.bf16.mxu1 %vm4527_vm9, %v4274_v40  ;;  %v664_v7 = vsel %vm414_vm13, %v662_v6, %v663_v5 }
 0x13d   : > { %829 = vrot.lane.b32.xlu0 %v4546_v62, %s4275_s9 }
 0x140   : > { %1420 = vrot.lane.b32.xlu1 %v4537_v57, %s4276_s20 }
 0x141   : > { %912 = vrot.lane.b32.xlu0 %v4566_v0, %s4275_s9 }
 0x142   : > { %3646 = vmatmul.mubr.msk.f32.vlgmr.msra.gmra.mrb[0].mxu1 %vm418_vm14, %v4535_v52 }
 0x143   : > { %3652 = vmatprep.mubr.msk.f32.mxu1 %vm418_vm14, %v4566_v0  ;;  %3893 = vmatpush3.bf16.msk.msra.mxu1 %vm4527_vm9, %v4274_v40 }
 0x144   : > { %1418 = vrot.lane.b32.xlu1 %v4544_v61, %s4276_s20  ;;  %3895 = vmatprep.subr.msk.bf16.mxu1 %vm4531_vm12, %v4274_v40 }
 0x145   : > { %1084 = vrot.lane.b32.xlu0 %v4537_v57, %s4277_s24 }
 0x148   : > { %914 = vrot.lane.b32.xlu1 %v4572_v4, %s4275_s9 }
 0x149   : > { %1082 = vrot.lane.b32.xlu0 %v4544_v61, %s4277_s24 }
 0x14a   : > { %3653 = vmatmul.mubr.msk.f32.vlgmr.msra.gmra.mrb[0].mxu1 %vm418_vm14, %v4572_v4 }
 0x14b   : > { %3659 = vmatprep.mubr.msk.f32.mxu1 %vm418_vm14, %v664_v7  ;;  %3897 = vmatpush3.bf16.msk.msra.mxu1 %vm4531_vm12, %v4274_v40 }
 0x14c   : > { %999 = vrot.lane.b32.xlu1 %v663_v5, %s4275_s9  ;;  %3899 = vmatprep.subr.msk.bf16.mxu1 %vm4501_vm3, %v4274_v40 }
 0x14d   : > { %997 = vrot.lane.b32.xlu0 %v664_v7, %s4275_s9 }
 0x150   : > { %1501 = vrot.lane.b32.xlu1 %v4546_v62, %s4276_s20 }
 0x151   : > { %1165 = vrot.lane.b32.xlu0 %v4546_v62, %s4277_s24 }
 0x152   : > { %3660 = vmatmul.mubr.msk.f32.vlgmr.msra.gmra.mrb[0].mxu1 %vm418_vm14, %v663_v5 }
 0x153   : > { %3901 = vmatpush3.bf16.msk.msra.mxu1 %vm4501_vm3, %v4274_v40 }
 0x154   : > { %1503 = vrot.lane.b32.xlu1 %v4535_v52, %s4276_s20  ;;  %3903 = vmatprep.subr.msk.bf16.mxu1 %vm4517_vm6, %v4274_v40 }
 0x155   : > { %1167 = vrot.lane.b32.xlu0 %v4535_v52, %s4277_s24 }
 0x158   : > { %1584 = vrot.lane.b32.xlu1 %v4566_v0, %s4276_s20 }
 0x159   : > { %1248 = vrot.lane.b32.xlu0 %v4566_v0, %s4277_s24 }
 0x15c   : > { %1586 = vrot.lane.b32.xlu1 %v4572_v4, %s4276_s20 }
 0x15d   : > { %1250 = vrot.lane.b32.xlu0 %v4572_v4, %s4277_s24 }
 0x160   : > { %1671 = vrot.lane.b32.xlu1 %v663_v5, %s4276_s20 }
 0x161   : > { %1335 = vrot.lane.b32.xlu0 %v663_v5, %s4277_s24 }
 0x164   : > { %2090 = vrot.lane.b32.xlu1 %v4544_v61, %s4278_s26 }
 0x165   : > { %1754 = vrot.lane.b32.xlu0 %v4544_v61, %s4279_s29 }
 0x168   : > { %1669 = vrot.lane.b32.xlu1 %v664_v7, %s4276_s20 }
 0x169   : > { %1333 = vrot.lane.b32.xlu0 %v664_v7, %s4277_s24 }
 0x16c   : > { %2092 = vrot.lane.b32.xlu1 %v4537_v57, %s4278_s26 }
 0x16d   : > { %1756 = vrot.lane.b32.xlu0 %v4537_v57, %s4279_s29 }
 0x170   : > { %2173 = vrot.lane.b32.xlu1 %v4546_v62, %s4278_s26 }
 0x171   : > { %1837 = vrot.lane.b32.xlu0 %v4546_v62, %s4279_s29 }
 0x174   : > { %2175 = vrot.lane.b32.xlu1 %v4535_v52, %s4278_s26 }
 0x175   : > { %1839 = vrot.lane.b32.xlu0 %v4535_v52, %s4279_s29 }
 0x178   : > { %2256 = vrot.lane.b32.xlu1 %v4566_v0, %s4278_s26 }
 0x179   : > { %1920 = vrot.lane.b32.xlu0 %v4566_v0, %s4279_s29 }
 0x17c   : > { %2258 = vrot.lane.b32.xlu1 %v4572_v4, %s4278_s26 }
 0x17d   : > { %1922 = vrot.lane.b32.xlu0 %v4572_v4, %s4279_s29 }
 0x180   : > { %2343 = vrot.lane.b32.xlu1 %v663_v5, %s4278_s26 }
 0x181   : > { %2007 = vrot.lane.b32.xlu0 %v663_v5, %s4279_s29 }
 0x184   : > { %2341 = vrot.lane.b32.xlu1 %v664_v7, %s4278_s26 }
 0x185   : > { %2005 = vrot.lane.b32.xlu0 %v664_v7, %s4279_s29 }
 0x188   : > { %2762 = vrot.lane.b32.xlu1 %v4544_v61, %s4280_s7 }
 0x189   : > { %2426 = vrot.lane.b32.xlu0 %v4544_v61, %s4281_s25 }
 0x18c   : > { %2764 = vrot.lane.b32.xlu1 %v4537_v57, %s4280_s7 }
 0x18d   : > { %2428 = vrot.lane.b32.xlu0 %v4537_v57, %s4281_s25 }
 0x190   : > { %2845 = vrot.lane.b32.xlu1 %v4546_v62, %s4280_s7 }
 0x191   : > { %2509 = vrot.lane.b32.xlu0 %v4546_v62, %s4281_s25 }
 0x194   : > { %2847 = vrot.lane.b32.xlu1 %v4535_v52, %s4280_s7 }
 0x195   : > { %2511 = vrot.lane.b32.xlu0 %v4535_v52, %s4281_s25 }
 0x198   : > { %2928 = vrot.lane.b32.xlu1 %v4566_v0, %s4280_s7 }
 0x199   : > { %2592 = vrot.lane.b32.xlu0 %v4566_v0, %s4281_s25 }
 0x19c   : > { %2930 = vrot.lane.b32.xlu1 %v4572_v4, %s4280_s7 }
 0x19d   : > { %2594 = vrot.lane.b32.xlu0 %v4572_v4, %s4281_s25 }
 0x1a0   : > { %3013 = vrot.lane.b32.xlu1 %v664_v7, %s4280_s7 }
 0x1a1   : > { %2677 = vrot.lane.b32.xlu0 %v664_v7, %s4281_s25 }
 0x1a4   : > { %3015 = vrot.lane.b32.xlu1 %v663_v5, %s4280_s7 }
 0x1a5   : > { %2679 = vrot.lane.b32.xlu0 %v663_v5, %s4281_s25 }
 0x1aa   : > { %v749_v8 = vpop.permute.xlu1 %748 }
 0x1ab   : > { %v747_v9 = vpop.permute.xlu0 %746 }
 0x1ac   : > { %3666 = vmatprep.mubr.msk.f32.mxu1 %vm418_vm14, %v747_v9 }
 0x1ad   : > { %3667 = vmatmul.mubr.msk.f32.vlgmr.msra.gmra.mrb[2].mxu1 %vm418_vm14, %v749_v8 }
 0x1ae   : > { %3905 = vmatpush3.bf16.msk.msra.mxu1 %vm4517_vm6, %v4274_v40  ;;  %v832_v10 = vpop.permute.xlu1 %831 }
 0x1af   : > { %v830_v11 = vpop.permute.xlu0 %829  ;;  %3907 = vmatprep.subr.msk.bf16.mxu1 %vm4527_vm9, %v4274_v40 }
 0x1b0   : > { %3673 = vmatprep.mubr.msk.f32.mxu1 %vm418_vm14, %v830_v11 }
 0x1b2   : > { %v1421_v12 = vpop.permute.xlu1 %1420 }
 0x1b3   : > { %v913_v13 = vpop.permute.xlu0 %912 }
 0x1b5   : > { %3674 = vmatmul.mubr.msk.f32.vlgmr.msra.gmra.mrb[2].mxu1 %vm418_vm14, %v832_v10 }
 0x1b6   : > { %3909 = vmatpush3.bf16.msk.msra.mxu1 %vm4527_vm9, %v4274_v40  ;;  %v1419_v14 = vpop.permute.xlu1 %1418  ;;  %3680 = vmatprep.mubr.msk.f32.mxu1 %vm418_vm14, %v913_v13 }
 0x1b7   : > { %v1085_v15 = vpop.permute.xlu0 %1084  ;;  %3911 = vmatprep.subr.msk.bf16.mxu1 %vm4531_vm12, %v4274_v40 }
 0x1ba   : > { %v915_v16 = vpop.permute.xlu1 %914 }
 0x1bb   : > { %v1083_v17 = vpop.permute.xlu0 %1082 }
 0x1bc   : > { %3694 = vmatprep.mubr.msk.f32.mxu0 %vm418_vm14, %v1083_v17 }
 0x1bd   : > { %3681 = vmatmul.mubr.msk.f32.vlgmr.msra.gmra.mrb[2].mxu1 %vm418_vm14, %v915_v16  ;;  %3695 = vmatmul.mubr.msk.f32.vlgmr.msra.gmra.mrb[6].mxu0 %vm418_vm14, %v1085_v15 }
 0x1be   : > { %3913 = vmatpush3.bf16.msk.msra.mxu1 %vm4531_vm12, %v4274_v40  ;;  %v1000_v18 = vpop.permute.xlu1 %999  ;;  %3921 = vmatpush3.bf16.msk.msra.mxu0 %vm4517_vm6, %v4274_v40 }
 0x1bf   : > { %v998_v19 = vpop.permute.xlu0 %997  ;;  %3931 = vmatprep.subr.msk.bf16.mxu1 %vm4501_vm3, %v4274_v40  ;;  %3923 = vmatprep.subr.msk.bf16.mxu0 %vm4527_vm9, %v4274_v40 }
 0x1c0   : > { %3687 = vmatprep.mubr.msk.f32.mxu1 %vm418_vm14, %v998_v19 }
 0x1c2   : > { %v1502_v20 = vpop.permute.xlu1 %1501 }
 0x1c3   : > { %v1166_v21 = vpop.permute.xlu0 %1165 }
 0x1c4   : > { %3701 = vmatprep.mubr.msk.f32.mxu0 %vm418_vm14, %v1166_v21 }
 0x1c5   : > { %3688 = vmatmul.mubr.msk.f32.vlgmr.msra.gmra.mrb[2].mxu1 %vm418_vm14, %v1000_v18 }
 0x1c6   : > { %3933 = vmatpush3.bf16.msk.msra.mxu1 %vm4501_vm3, %v4274_v40  ;;  %v1504_v22 = vpop.permute.xlu1 %1503  ;;  %3722 = vmatprep.mubr.msk.f32.mxu1 %vm418_vm14, %v1419_v14 }
 0x1c7   : > { %v1168_v23 = vpop.permute.xlu0 %1167  ;;  %3935 = vmatprep.subr.msk.bf16.mxu1 %vm4517_vm6, %v4274_v40 }
 0x1c8   : > { %3702 = vmatmul.mubr.msk.f32.vlgmr.msra.gmra.mrb[6].mxu0 %vm418_vm14, %v1168_v23 }
 0x1c9   : > { %3723 = vmatmul.mubr.msk.f32.vlgmr.msra.gmra.mrb[4].mxu1 %vm418_vm14, %v1421_v12  ;;  %3925 = vmatpush3.bf16.msk.msra.mxu0 %vm4527_vm9, %v4274_v40 }
 0x1ca   : > { %3937 = vmatpush3.bf16.msk.msra.mxu1 %vm4517_vm6, %v4274_v40  ;;  %v1585_v24 = vpop.permute.xlu1 %1584  ;;  %3729 = vmatprep.mubr.msk.f32.mxu1 %vm418_vm14, %v1502_v20 }
 0x1cb   : > { %v1249_v25 = vpop.permute.xlu0 %1248  ;;  %3939 = vmatprep.subr.msk.bf16.mxu1 %vm4527_vm9, %v4274_v40  ;;  %3927 = vmatprep.subr.msk.bf16.mxu0 %vm4531_vm12, %v4274_v40 }
 0x1cc   : > { %3708 = vmatprep.mubr.msk.f32.mxu0 %vm418_vm14, %v1249_v25 }
 0x1ce   : > { %v1587_v26 = vpop.permute.xlu1 %1586 }
 0x1cf   : > { %v1251_v27 = vpop.permute.xlu0 %1250 }
 0x1d0   : > { %3709 = vmatmul.mubr.msk.f32.vlgmr.msra.gmra.mrb[6].mxu0 %vm418_vm14, %v1251_v27 }
 0x1d1   : > { %3730 = vmatmul.mubr.msk.f32.vlgmr.msra.gmra.mrb[4].mxu1 %vm418_vm14, %v1504_v22  ;;  %3929 = vmatpush3.bf16.msk.msra.mxu0 %vm4531_vm12, %v4274_v40 }
 0x1d2   : > { %3941 = vmatpush3.bf16.msk.msra.mxu1 %vm4527_vm9, %v4274_v40  ;;  %v1672_v28 = vpop.permute.xlu1 %1671  ;;  %3736 = vmatprep.mubr.msk.f32.mxu1 %vm418_vm14, %v1585_v24 }
 0x1d3   : > { %v1336_v29 = vpop.permute.xlu0 %1335  ;;  %3943 = vmatprep.subr.msk.bf16.mxu1 %vm4531_vm12, %v4274_v40  ;;  %3947 = vmatprep.subr.msk.bf16.mxu0 %vm4501_vm3, %v4274_v40 }
 0x1d6   : > { %v2091_v30 = vpop.permute.xlu1 %2090 }
 0x1d7   : > { %v1755_v31 = vpop.permute.xlu0 %1754 }
 0x1d9   : > { %3737 = vmatmul.mubr.msk.f32.vlgmr.msra.gmra.mrb[4].mxu1 %vm418_vm14, %v1587_v26 }
 0x1da   : > { %3945 = vmatpush3.bf16.msk.msra.mxu1 %vm4531_vm12, %v4274_v40  ;;  %v1670_v32 = vpop.permute.xlu1 %1669 }
 0x1db   : > { %v1334_v33 = vpop.permute.xlu0 %1333  ;;  %3743 = vmatprep.mubr.msk.f32.mxu1 %vm418_vm14, %v1670_v32  ;;  %3963 = vmatprep.subr.msk.bf16.mxu1 %vm4501_vm3, %v4274_v40 }
 0x1dc   : > { %3715 = vmatprep.mubr.msk.f32.mxu0 %vm418_vm14, %v1334_v33 }
 0x1dd   : > { %3716 = vmatmul.mubr.msk.f32.vlgmr.msra.gmra.mrb[6].mxu0 %vm418_vm14, %v1336_v29 }
 0x1de   : > { %v2093_v34 = vpop.permute.xlu1 %2092  ;;  %3949 = vmatpush3.bf16.msk.msra.mxu0 %vm4501_vm3, %v4274_v40  ;;  %3750 = vmatprep.mubr.msk.f32.mxu0 %vm418_vm14, %v1755_v31 }
 0x1df   : > { %v1757_v35 = vpop.permute.xlu0 %1756  ;;  %3951 = vmatprep.subr.msk.bf16.mxu0 %vm4517_vm6, %v4274_v40 }
 0x1e1   : > { %3744 = vmatmul.mubr.msk.f32.vlgmr.msra.gmra.mrb[4].mxu1 %vm418_vm14, %v1672_v28  ;;  %3751 = vmatmul.mubr.msk.f32.vlgmr.msra.gmra.mrb[8].mxu0 %vm418_vm14, %v1757_v35 }
 0x1e2   : > { %3965 = vmatpush3.bf16.msk.msra.mxu1 %vm4501_vm3, %v4274_v40  ;;  %v2174_v36 = vpop.permute.xlu1 %2173  ;;  %3778 = vmatprep.mubr.msk.f32.mxu1 %vm418_vm14, %v2091_v30 }
 0x1e3   : > { %v1838_v37 = vpop.permute.xlu0 %1837  ;;  %3967 = vmatprep.subr.msk.bf16.mxu1 %vm4517_vm6, %v4274_v40  ;;  %3953 = vmatpush3.bf16.msk.msra.mxu0 %vm4517_vm6, %v4274_v40 }
 0x1e4   : > { %3757 = vmatprep.mubr.msk.f32.mxu0 %vm418_vm14, %v1838_v37  ;;  %3955 = vmatprep.subr.msk.bf16.mxu0 %vm4527_vm9, %v4274_v40 }
 0x1e5   : > { %3779 = vmatmul.mubr.msk.f32.vlgmr.msra.gmra.mrb[6].mxu1 %vm418_vm14, %v2093_v34 }
 0x1e6   : > { %3969 = vmatpush3.bf16.msk.msra.mxu1 %vm4517_vm6, %v4274_v40  ;;  %v2176_v38 = vpop.permute.xlu1 %2175  ;;  %3785 = vmatprep.mubr.msk.f32.mxu1 %vm418_vm14, %v2174_v36 }
 0x1e7   : > { %v1840_v42 = vpop.permute.xlu0 %1839  ;;  %3971 = vmatprep.subr.msk.bf16.mxu1 %vm4527_vm9, %v4274_v40 }
 0x1e9   : > { %3758 = vmatmul.mubr.msk.f32.vlgmr.msra.gmra.mrb[8].mxu0 %vm418_vm14, %v1840_v42 }
 0x1ea   : > { %v2257_v43 = vpop.permute.xlu1 %2256  ;;  %3957 = vmatpush3.bf16.msk.msra.mxu0 %vm4527_vm9, %v4274_v40 }
 0x1eb   : > { %v1921_v45 = vpop.permute.xlu0 %1920  ;;  %3959 = vmatprep.subr.msk.bf16.mxu0 %vm4531_vm12, %v4274_v40 }
 0x1ec   : > { %3764 = vmatprep.mubr.msk.f32.mxu0 %vm418_vm14, %v1921_v45 }
 0x1ed   : > { %3786 = vmatmul.mubr.msk.f32.vlgmr.msra.gmra.mrb[6].mxu1 %vm418_vm14, %v2176_v38 }
 0x1ee   : > { %3973 = vmatpush3.bf16.msk.msra.mxu1 %vm4527_vm9, %v4274_v40  ;;  %v2259_v46 = vpop.permute.xlu1 %2258  ;;  %3792 = vmatprep.mubr.msk.f32.mxu1 %vm418_vm14, %v2257_v43 }
 0x1ef   : > { %v1923_v48 = vpop.permute.xlu0 %1922  ;;  %3975 = vmatprep.subr.msk.bf16.mxu1 %vm4531_vm12, %v4274_v40 }
 0x1f1   : > { %3765 = vmatmul.mubr.msk.f32.vlgmr.msra.gmra.mrb[8].mxu0 %vm418_vm14, %v1923_v48 }
 0x1f2   : > { %v2344_v49 = vpop.permute.xlu1 %2343  ;;  %3961 = vmatpush3.bf16.msk.msra.mxu0 %vm4531_vm12, %v4274_v40 }
 0x1f3   : > { %v2008_v50 = vpop.permute.xlu0 %2007  ;;  %3979 = vmatprep.subr.msk.bf16.mxu0 %vm4501_vm3, %v4274_v40 }
 0x1f5   : > { %3793 = vmatmul.mubr.msk.f32.vlgmr.msra.gmra.mrb[6].mxu1 %vm418_vm14, %v2259_v46 }
 0x1f6   : > { %3977 = vmatpush3.bf16.msk.msra.mxu1 %vm4531_vm12, %v4274_v40  ;;  %v2342_v51 = vpop.permute.xlu1 %2341 }
 0x1f7   : > { %v2006_v52 = vpop.permute.xlu0 %2005  ;;  %3799 = vmatprep.mubr.msk.f32.mxu1 %vm418_vm14, %v2342_v51  ;;  %3995 = vmatprep.subr.msk.bf16.mxu1 %vm4501_vm3, %v4274_v40 }
 0x1f8   : > { %3771 = vmatprep.mubr.msk.f32.mxu0 %vm418_vm14, %v2006_v52 }
 0x1f9   : > { %3772 = vmatmul.mubr.msk.f32.vlgmr.msra.gmra.mrb[8].mxu0 %vm418_vm14, %v2008_v50 }
 0x1fa   : > { %v2763_v53 = vpop.permute.xlu1 %2762  ;;  %3981 = vmatpush3.bf16.msk.msra.mxu0 %vm4501_vm3, %v4274_v40 }
 0x1fb   : > { %v2427_v54 = vpop.permute.xlu0 %2426  ;;  %3983 = vmatprep.subr.msk.bf16.mxu0 %vm4517_vm6, %v4274_v40 }
 0x1fc   : > { %3806 = vmatprep.mubr.msk.f32.mxu0 %vm418_vm14, %v2427_v54 }
 0x1fd   : > { %3800 = vmatmul.mubr.msk.f32.vlgmr.msra.gmra.mrb[6].mxu1 %vm418_vm14, %v2344_v49 }
 0x1fe   : > { %3997 = vmatpush3.bf16.msk.msra.mxu1 %vm4501_vm3, %v4274_v40  ;;  %v2765_v55 = vpop.permute.xlu1 %2764  ;;  %3834 = vmatprep.mubr.msk.f32.mxu1 %vm418_vm14, %v2763_v53 }
 0x1ff   : > { %v2429_v56 = vpop.permute.xlu0 %2428  ;;  %3999 = vmatprep.subr.msk.bf16.mxu1 %vm4517_vm6, %v4274_v40 }
 0x200   : > { %3807 = vmatmul.mubr.msk.f32.vlgmr.msra.gmra.mrb[10].mxu0 %vm418_vm14, %v2429_v56 }
 0x201   : > { %3985 = vmatpush3.bf16.msk.msra.mxu0 %vm4517_vm6, %v4274_v40  ;;  %3835 = vmatmul.mubr.msk.f32.vlgmr.msra.gmra.mrb[8].mxu1 %vm418_vm14, %v2765_v55 }
 0x202   : > { %4001 = vmatpush3.bf16.msk.msra.mxu1 %vm4517_vm6, %v4274_v40  ;;  %v2846_v39 = vpop.permute.xlu1 %2845  ;;  %3987 = vmatprep.subr.msk.bf16.mxu0 %vm4527_vm9, %v4274_v40 }
 0x203   : > { %v2510_v57 = vpop.permute.xlu0 %2509  ;;  %3841 = vmatprep.mubr.msk.f32.mxu1 %vm418_vm14, %v2846_v39  ;;  %4003 = vmatprep.subr.msk.bf16.mxu1 %vm4527_vm9, %v4274_v40 }
 0x204   : > { %3813 = vmatprep.mubr.msk.f32.mxu0 %vm418_vm14, %v2510_v57 }
 0x206   : > { %v2848_v58 = vpop.permute.xlu1 %2847 }
 0x207   : > { %v2512_v59 = vpop.permute.xlu0 %2511 }
 0x208   : > { %3814 = vmatmul.mubr.msk.f32.vlgmr.msra.gmra.mrb[10].mxu0 %vm418_vm14, %v2512_v59 }
 0x209   : > { %3989 = vmatpush3.bf16.msk.msra.mxu0 %vm4527_vm9, %v4274_v40  ;;  %3842 = vmatmul.mubr.msk.f32.vlgmr.msra.gmra.mrb[8].mxu1 %vm418_vm14, %v2848_v58 }
 0x20a   : > { %4005 = vmatpush3.bf16.msk.msra.mxu1 %vm4527_vm9, %v4274_v40  ;;  %v2929_v41 = vpop.permute.xlu1 %2928  ;;  %3991 = vmatprep.subr.msk.bf16.mxu0 %vm4531_vm12, %v4274_v40 }
 0x20b   : > { %v2593_v60 = vpop.permute.xlu0 %2592  ;;  %3848 = vmatprep.mubr.msk.f32.mxu1 %vm418_vm14, %v2929_v41  ;;  %4007 = vmatprep.subr.msk.bf16.mxu1 %vm4531_vm12, %v4274_v40 }
 0x20c   : > { %3820 = vmatprep.mubr.msk.f32.mxu0 %vm418_vm14, %v2593_v60 }
 0x20e   : > { %v2931_v61 = vpop.permute.xlu1 %2930 }
 0x20f   : > { %v2595_v62 = vpop.permute.xlu0 %2594 }
 0x210   : > { %3821 = vmatmul.mubr.msk.f32.vlgmr.msra.gmra.mrb[10].mxu0 %vm418_vm14, %v2595_v62 }
 0x211   : > { %3993 = vmatpush3.bf16.msk.msra.mxu0 %vm4531_vm12, %v4274_v40  ;;  %3849 = vmatmul.mubr.msk.f32.vlgmr.msra.gmra.mrb[8].mxu1 %vm418_vm14, %v2931_v61 }
 0x212   : > { %4009 = vmatpush3.bf16.msk.msra.mxu1 %vm4531_vm12, %v4274_v40  ;;  %v3014_v44 = vpop.permute.xlu1 %3013 }
 0x213   : > { %v2678_v63 = vpop.permute.xlu0 %2677  ;;  %3855 = vmatprep.mubr.msk.f32.mxu1 %vm418_vm14, %v3014_v44 }
 0x214   : > { %3827 = vmatprep.mubr.msk.f32.mxu0 %vm418_vm14, %v2678_v63 }
 0x216   : > { %v3016_v1 = vpop.permute.xlu1 %3015 }
 0x217   : > { %v2680_v0 = vpop.permute.xlu0 %2679 }
 0x218   : > { %3828 = vmatmul.mubr.msk.f32.vlgmr.msra.gmra.mrb[10].mxu0 %vm418_vm14, %v2680_v0 }
 0x219   : > { %3856 = vmatmul.mubr.msk.f32.vlgmr.msra.gmra.mrb[8].mxu1 %vm418_vm14, %v3016_v1 }
 0x225   : > { %v3661_v2 = vpop.f32.mrb[0].mxu1 }
 0x226   : > { %v735_v3 = vpop.f32.mrb[1].mxu1 }
 0x227   : > { %v3120_v4 = vrot.slane %v735_v3, 4 }
 0x298   : > { %v3689_v5 = vpop.f32.mrb[2].mxu1 }
 0x299   : > { %v3141_v47 = vrot.slane %v3689_v5, 4  ;;  %v1071_v40 = vpop.f32.mrb[3].mxu1 }
 0x29a   : > { %v3099_v6 = vrot.slane %v1071_v40, 4  ;;  %v3131_v7 = vsel %vm414_vm13, %v3120_v4, %v1071_v40 }
 0x29b   : > { %v3152_v8 = vsel %vm414_vm13, %v3661_v2, %v3141_v47  ;;  %3443 = vst.msk [vmem:[%s4866_s30 + $0x20] sm:$0xff] %vm3114_vm15, %v3131_v7 }
 0x29c   : > { %3447 = vst.msk [vmem:[%s4866_s30 + $0x40] sm:$0xff] %vm3114_vm15, %v3152_v8  ;;  %v3110_v9 = vsel %vm414_vm13, %v735_v3, %v3099_v6 }
 0x29d   : > { %3115 = vst.msk [vmem:[%s4866_s30] sm:$0xff] %vm3114_vm15, %v3110_v9 }
 0x2b0   : > { %v3717_v10 = vpop.f32.mrb[6].mxu0 }
 0x2b1   : > { %v1407_v11 = vpop.f32.mrb[7].mxu0 }
 0x2b2   : > { %v3123_v12 = vrot.slane %v1407_v11, 4 }
 0x2b4   : > { %v3745_v13 = vpop.f32.mrb[4].mxu1 }
 0x2b5   : > { %v3144_v14 = vrot.slane %v3745_v13, 4  ;;  %v1743_v15 = vpop.f32.mrb[5].mxu1 }
 0x2b6   : > { %v3102_v16 = vrot.slane %v1743_v15, 4  ;;  %v3132_v17 = vsel %vm414_vm13, %v3123_v12, %v1743_v15 }
 0x2b7   : > { %v3153_v18 = vsel %vm414_vm13, %v3717_v10, %v3144_v14  ;;  %3444 = vst.msk [vmem:[%s4866_s30 + $0x28] sm:$0xff] %vm3114_vm15, %v3132_v17 }
 0x2b8   : > { %3448 = vst.msk [vmem:[%s4866_s30 + $0x48] sm:$0xff] %vm3114_vm15, %v3153_v18  ;;  %v3111_v19 = vsel %vm414_vm13, %v1407_v11, %v3102_v16 }
 0x2b9   : > { %3116 = vst.msk [vmem:[%s4866_s30 + $0x8] sm:$0xff] %vm3114_vm15, %v3111_v19 }
 0x2cc   : > { %v3773_v20 = vpop.f32.mrb[8].mxu0 }
 0x2cd   : > { %v2079_v21 = vpop.f32.mrb[9].mxu0 }
 0x2ce   : > { %v3126_v22 = vrot.slane %v2079_v21, 4 }
 0x2d0   : > { %v3801_v23 = vpop.f32.mrb[6].mxu1 }
 0x2d1   : > { %v3147_v24 = vrot.slane %v3801_v23, 4  ;;  %v2415_v25 = vpop.f32.mrb[7].mxu1 }
 0x2d2   : > { %v3105_v26 = vrot.slane %v2415_v25, 4  ;;  %v3133_v27 = vsel %vm414_vm13, %v3126_v22, %v2415_v25 }
 0x2d3   : > { %v3154_v28 = vsel %vm414_vm13, %v3773_v20, %v3147_v24  ;;  %3445 = vst.msk [vmem:[%s4866_s30 + $0x30] sm:$0xff] %vm3114_vm15, %v3133_v27 }
 0x2d4   : > { %3449 = vst.msk [vmem:[%s4866_s30 + $0x50] sm:$0xff] %vm3114_vm15, %v3154_v28  ;;  %v3112_v29 = vsel %vm414_vm13, %v2079_v21, %v3105_v26 }
 0x2d5   : > { %3117 = vst.msk [vmem:[%s4866_s30 + $0x10] sm:$0xff] %vm3114_vm15, %v3112_v29 }
 0x2eb   : > { %v3829_v30 = vpop.f32.mrb[10].mxu0 }
 0x2ec   : > { %v2751_v31 = vpop.f32.mrb[11].mxu0  ;;  %v3857_v32 = vpop.f32.mrb[8].mxu1 }
 0x2ed   : > { %v3129_v33 = vrot.slane %v2751_v31, 4  ;;  %v3150_v34 = vrot.slane %v3857_v32, 4  ;;  %v3087_v35 = vpop.f32.mrb[9].mxu1 }
 0x2ee   : > { %v3108_v36 = vrot.slane %v3087_v35, 4 }
 0x2ef   : > { %v3155_v37 = vsel %vm414_vm13, %v3829_v30, %v3150_v34  ;;  %v3134_v38 = vsel %vm414_vm13, %v3129_v33, %v3087_v35 }
 0x2f0   : > { %3450 = vst.msk [vmem:[%s4866_s30 + $0x58] sm:$0xff] %vm3114_vm15, %v3155_v37  ;;  %v3113_v42 = vsel %vm414_vm13, %v2751_v31, %v3108_v36  ;;  %3446 = vst.msk [vmem:[%s4866_s30 + $0x38] sm:$0xff] %vm3114_vm15, %v3134_v38 }
 0x2f1   : > { %3118 = vst.msk [vmem:[%s4866_s30 + $0x18] sm:$0xff] %vm3114_vm15, %v3113_v42 }
 0x2f2   : > { %s3451_s8 = sshll.u32 %s4251_s15, 2  ;;  %s4061_s10 = smul.u32 24, %s4255_s16 }
 0x2f3   : > { %s3193_s5 = sshll.u32 %s4866_s30, 4  ;;  %s4282_s20 = smov 512   ;;  %s3194_s5 = int_to_ptr.vmem [resolvable:$true] %s3193_s5 }
 0x2f4   : > { %s3174_s27 = sadd.s32 %s4061_s10, %s3451_s8  ;;  %p4969_p8 = scmp.ne.s32.totalorder %s4958_s28, 0 }
 0x2f5   : > { %s3452_s9 = sshll.u32 %s3174_s27, 7  ;;  %s4283_s29 = smov 1024  }
 0x2f6   : > { %4064 = sst [smem:[#allocation7]] (%p4969_p8), %s4282_s20  ;;  %s3176_s26 = scalar_lea.hbm %s4954_s3, %s3452_s9 }
 0x2f7   : > { %4065 = sst [smem:[#allocation7 + $0x1]] (%p4969_p8), %s4283_s29  ;;  %s4284_s7 = smov 4  }
 0x2f8   : > { %4066 = sst [smem:[#allocation7 + $0x2]] (%p4969_p8), %s4284_s7  ;;  %s4285_s15 = smov 128  }
 0x2f9   : > { %4067 = sst [smem:[#allocation7 + $0x3]] (%p4969_p8), %s4285_s15  ;;  %s4286_s16 = smov 8  }
 0x2fa   : > { %4068 = sst [smem:[#allocation7 + $0x4]] (%p4969_p8), %s4285_s15  ;;  %s4287_s25 = smov [#allocation6]  }
 0x2fb   : > { %4069 = sst [smem:[#allocation7 + $0x5]] (%p4969_p8), %s4286_s16  ;;  %s4288_s30 = smov 0  }
 0x2fc   : > { %4070 = dma.general (%p4969_p8), %s3194_s5, 1536, %s3176_s26, %s3162_s21, %s4287_s25, [#allocation7], %s4288_s30, 0  }
 0x2fd PF: > { %p4081_p9 = scmp.ge.s32.totalorder %s4267_s19, 2  ;;  %s3221_s8 = sand.u32 1, %s4239_s12  }
 0x2fe   : > { %p4970_p12 = scmp.ne.s32.totalorder %s4959_s4, 0  ;;  %s3222_s10 = scalar_lea.sflag [#allocation4], %s3221_s8 }
 0x300   : > { %p4077_p0 = pnand %p4081_p9, %p4970_p12 }
 0x302   : > { %4234 = dma.done.wait (!%p4077_p0), %s3222_s10, 1536  }
 0x303   : > { %4236 = vsyncadd (!%p4077_p0), %s3222_s10, 4294965760  ;;  %s19_s19 = sadd.s32 1, %s4267_s19   ;;  %s4971_s12 = smov %s4243_s13 }
 0x304   : > { %p16_p11 = scmp.ge.s32.totalorder %s19_s19, 6   ;;  %s4972_s13 = smov %s4247_s14 }
 0x305   : > { %s4973_s14 = smov %s4387_s6  ;;  %s4974_s15 = smov %s4259_s17 }
 0x306   : > { %s4975_s16 = smov %s4263_s18  ;;  %s4976_s17 = smov %s4979_s22 }
 0x307   : > { %s4977_s18 = smov %s4983_s23  ;;  %18 = sbr.rel (!%p16_p11) target bundleno = 7 (0x7), region = 84 }
 0x30e   :  { %3227 = vsyncpa [#allocation3], 1 }
 0x30f   :  { %3229 = vsyncpa [#allocation3 + $0x1], 1 }
 0x310   :  { %3230 = vsyncpa [#allocation4], 1 }
 0x311   :  { %3232 = vsyncpa [#allocation4 + $0x1], 1 }

</bundles_post_ra>
